<compile_context>
chip_gen: v7x
topology: tpu7x:2x2x1
jax: 0.10.0
libtpu: 0.0.40
codegen_flags: <defaults>
</compile_context>

<pallas_src>
import jax
import jax.numpy as jnp
from jax import lax
from jax.experimental import pallas as pl
from jax.experimental.pallas import tpu as pltpu


def predictor_kernel(scalars_ref,   # SMEM: [1, 2] = (prelu_alpha, b2*std + mean)
                     x_ref,         # VMEM: [TN, D]   bf16
                     w1_ref,        # VMEM: [D, 2D]   bf16
                     b1_ref,        # VMEM: [1, 2D]   f32
                     w2_ref,        # VMEM: [1, 2D]   f32  (= w2.T * std)
                     o_ref):        # VMEM: [1, TN]   f32  (lane-dense output row)
    alpha = scalars_ref[0, 0]
    b2_fold = scalars_ref[0, 1]

    # Linear(D -> 2D): bf16 operands on the MXU, f32 accumulation.
    h = jnp.dot(x_ref[...], w1_ref[...], preferred_element_type=jnp.float32)
    h = h + b1_ref[...]

    # PReLU (single shared slope, nn.PReLU() default), f32 on the VPU.
    h = jnp.where(h >= 0.0, h, alpha * h)

    # Dropout(p=0.2) -> identity at inference time (eval-mode semantics).

    # Linear(2D -> 1) with the `* std` de-normalization folded into w2.
    # Computed as w2_row contracted against h's feature axis so the result
    # lands directly as a lane-dense (1, TN) row.
    out = lax.dot_general(w2_ref[...], h,
                          dimension_numbers=(((1,), (1,)), ((), ())),
                          preferred_element_type=jnp.float32)   # (1, TN)

    # `+ mean` de-normalization folded into b2.
    o_ref[...] = out + b2_fold


def predictor_regressor(node_fused, w1, b1, alpha, w2, b2, std, mean, *,
                        tile_n=512):
    """node_fused: [N, D] float32 -> [N, 1] float32 (already de-normalized)."""
    N, D = node_fused.shape
    D2 = 2 * D
    assert w1.shape == (D, D2) and w2.shape == (D2, 1)
    assert tile_n % 128 == 0, "keep the row tile lane-friendly"

    # Pad the node count up to the row tile (padded rows sliced off below).
    n_blocks = pl.cdiv(N, tile_n)
    n_pad = n_blocks * tile_n
    x = node_fused.astype(jnp.bfloat16)
    if n_pad != N:
        x = jnp.pad(x, ((0, n_pad - N), (0, 0)))

    w1_bf = w1.astype(jnp.bfloat16)
    b1_2d = b1.reshape(1, D2).astype(jnp.float32)

    # Fold de-normalization into layer 2:  (h@w2 + b2)*std + mean
    #                                   ==  h @ (w2*std) + (b2*std + mean)
    std_f = jnp.asarray(std, jnp.float32)
    mean_f = jnp.asarray(mean, jnp.float32)
    w2_row = (w2.reshape(1, D2).astype(jnp.float32) * std_f)
    b2_fold = (b2.reshape(()).astype(jnp.float32) * std_f + mean_f)
    scalars = jnp.stack([jnp.asarray(alpha, jnp.float32), b2_fold]).reshape(1, 2)

    flops = 2 * n_pad * D * D2 + 2 * n_pad * D2
    bytes_accessed = (x.size * 2 + w1_bf.size * 2 + b1_2d.size * 4
                      + w2_row.size * 4 + n_pad * 4)

    out = pl.pallas_call(
        predictor_kernel,
        out_shape=jax.ShapeDtypeStruct((1, n_pad), jnp.float32),
        grid_spec=pltpu.PrefetchScalarGridSpec(
            num_scalar_prefetch=0,
            grid=(n_blocks,),
            in_specs=[
                pl.BlockSpec(memory_space=pltpu.SMEM),            # scalars
                pl.BlockSpec((tile_n, D), lambda i: (i, 0)),      # x tile (bf16)
                pl.BlockSpec((D, D2), lambda i: (0, 0)),          # W1 (resident)
                pl.BlockSpec((1, D2), lambda i: (0, 0)),          # b1
                pl.BlockSpec((1, D2), lambda i: (0, 0)),          # W2 row (*std)
            ],
            out_specs=pl.BlockSpec((1, tile_n), lambda i: (0, i)),  # lane-dense
        ),
        compiler_params=pltpu.CompilerParams(
            dimension_semantics=("parallel",)),
        cost_estimate=pl.CostEstimate(flops=int(flops), transcendentals=0,
                                      bytes_accessed=int(bytes_accessed)),
    )(scalars, x, w1_bf, b1_2d, w2_row)

    # (1, n_pad) slab -> (N, 1) column, dropping padded rows.
    return out.reshape(-1)[:N].reshape(N, 1)


def reference_jax(node_fused, w1, b1, alpha, w2, b2, std, mean, *,
                  bf16_matmul=False):
    if bf16_matmul:
        h = jnp.dot(node_fused.astype(jnp.bfloat16), w1.astype(jnp.bfloat16),
                    preferred_element_type=jnp.float32)
    else:
        h = node_fused @ w1
    h = h + b1
    h = jnp.where(h >= 0.0, h, alpha * h)
    out = h @ w2 + b2
    return out * std + mean


if __name__ == "__main__":
    key = jax.random.PRNGKey(0)
    k_x, k_w1, k_b1, k_w2, k_b2, k_mask = jax.random.split(key, 6)

    # Shapes consistent with the forward pass:
    #   fusion_dim = gnn hidden_dim + geom hidden_dim = 32 + 32 = 64
    #   N nodes = 1000 (non-multiple of the tile -> exercises padding path)
    N, D = 1000, 64
    D2 = 2 * D

    # "node_fused" = output of graph_net / geometry_net / cross_attn (synthetic)
    node_fused = jax.random.normal(k_x, (N, D), dtype=jnp.float32)

    # PredictorRegressor parameters (deterministic init, torch-Linear-like scale)
    w1 = jax.random.uniform(k_w1, (D, D2), jnp.float32, -1.0, 1.0) / jnp.sqrt(D)
    b1 = jax.random.uniform(k_b1, (D2,), jnp.float32, -1.0, 1.0) / jnp.sqrt(D)
    w2 = jax.random.uniform(k_w2, (D2, 1), jnp.float32, -1.0, 1.0) / jnp.sqrt(D2)
    b2 = jax.random.uniform(k_b2, (1,), jnp.float32, -1.0, 1.0) / jnp.sqrt(D2)
    prelu_alpha = 0.25          # nn.PReLU() default init
    std, mean = 2.5, 0.75       # registered buffers

    # Run the Pallas kernel (full-node prediction + de-normalization)
    pred = predictor_regressor(node_fused, w1, b1, prelu_alpha, w2, b2, std, mean,
                               tile_n=512)
    pred = jax.block_until_ready(pred)

    # nmr_pred = pred[mask]   (boolean gather is glue, done in host-side JAX)
    mask = jax.random.bernoulli(k_mask, 0.5, (N,))
    nmr_pred = pred[mask]

    # Correctness: tight check vs a reference using the same bf16 operand cast,
    # loose check vs the pure-f32 reference (bf16 rounding of x/w1 only).
    ref_bf16 = reference_jax(node_fused, w1, b1, prelu_alpha, w2, b2, std, mean,
                             bf16_matmul=True)
    ref_f32 = reference_jax(node_fused, w1, b1, prelu_alpha, w2, b2, std, mean,
                            bf16_matmul=False)
    assert pred.shape == (N, 1)
    assert jnp.allclose(pred, ref_bf16, atol=2e-3, rtol=2e-3), "mismatch vs bf16 ref"
    assert jnp.allclose(pred, ref_f32, atol=5e-2, rtol=5e-2), "mismatch vs f32 ref"
    assert nmr_pred.shape[0] == int(mask.sum())

    print("KERNEL_OK")
</pallas_src>

<mosaic_0001>
module attributes {stable_mosaic.version = 11 : i64} {
  func.func @predictor_kernel(%arg0: i32, %arg1: memref<1x2xf32, #tpu.memory_space<smem>>, %arg2: memref<512x64xbf16, #tpu.memory_space<vmem>>, %arg3: memref<64x128xbf16, #tpu.memory_space<vmem>>, %arg4: memref<1x128xf32, #tpu.memory_space<vmem>>, %arg5: memref<1x128xf32, #tpu.memory_space<vmem>>, %arg6: memref<1x512xf32, #tpu.memory_space<vmem>>) attributes {dimension_semantics = [#tpu.dimension_semantics<parallel>], iteration_bounds = array<i64: 2>, scalar_prefetch = 0 : i64, scratch_operands = 0 : i64, tpu.core_type = #tpu.core_type<tc>, window_params = [{transform_indices = @transform_0, window_bounds = array<i64: 1, 2>}, {transform_indices = @transform_1, window_bounds = array<i64: 512, 64>}, {pipeline_mode = #tpu.pipeline_mode<synchronous>, transform_indices = @transform_2, window_bounds = array<i64: 64, 128>}, {pipeline_mode = #tpu.pipeline_mode<synchronous>, transform_indices = @transform_3, window_bounds = array<i64: 1, 128>}, {pipeline_mode = #tpu.pipeline_mode<synchronous>, transform_indices = @transform_4, window_bounds = array<i64: 1, 128>}, {transform_indices = @transform_5, window_bounds = array<i64: 1, 512>}]} {
    %c0 = arith.constant 0 : index
    %c0_0 = arith.constant 0 : index
    %0 = memref.load %arg1[%c0, %c0_0] : memref<1x2xf32, #tpu.memory_space<smem>>
    %c0_1 = arith.constant 0 : index
    %c1 = arith.constant 1 : index
    %1 = memref.load %arg1[%c0_1, %c1] : memref<1x2xf32, #tpu.memory_space<smem>>
    %c0_2 = arith.constant 0 : index
    %c0_3 = arith.constant 0 : index
    %2 = vector.load %arg2[%c0_2, %c0_3] : memref<512x64xbf16, #tpu.memory_space<vmem>>, vector<512x64xbf16>
    %c0_4 = arith.constant 0 : index
    %c0_5 = arith.constant 0 : index
    %3 = vector.load %arg3[%c0_4, %c0_5] : memref<64x128xbf16, #tpu.memory_space<vmem>>, vector<64x128xbf16>
    %cst = arith.constant dense<0.000000e+00> : vector<512x128xf32>
    %4 = tpu.matmul %2, %3, %cst {dimension_numbers = #tpu.dot_dimension_numbers<[1], [0], [0], [1], [0, 0, 1, 1], [], []>} : vector<512x64xbf16>, vector<64x128xbf16>, vector<512x128xf32> -> vector<512x128xf32>
    %c0_6 = arith.constant 0 : index
    %c0_7 = arith.constant 0 : index
    %5 = vector.load %arg4[%c0_6, %c0_7] : memref<1x128xf32, #tpu.memory_space<vmem>>, vector<1x128xf32>
    %6 = vector.broadcast %5 : vector<1x128xf32> to vector<512x128xf32>
    %7 = arith.addf %4, %6 : vector<512x128xf32>
    %cst_8 = arith.constant 0.000000e+00 : f32
    %8 = vector.broadcast %cst_8 : f32 to vector<512x128xf32>
    %9 = arith.cmpf oge, %7, %8 : vector<512x128xf32>
    %10 = vector.broadcast %0 : f32 to vector<512x128xf32>
    %11 = arith.mulf %10, %7 : vector<512x128xf32>
    %12 = arith.select %9, %7, %11 : vector<512x128xi1>, vector<512x128xf32>
    %c0_9 = arith.constant 0 : index
    %c0_10 = arith.constant 0 : index
    %13 = vector.load %arg5[%c0_9, %c0_10] : memref<1x128xf32, #tpu.memory_space<vmem>>, vector<1x128xf32>
    %cst_11 = arith.constant dense<0.000000e+00> : vector<1x512xf32>
    %14 = tpu.matmul %13, %12, %cst_11 {dimension_numbers = #tpu.dot_dimension_numbers<[1], [1], [0], [0], [0, 0, 1, 0], [], []>} : vector<1x128xf32>, vector<512x128xf32>, vector<1x512xf32> -> vector<1x512xf32>
    %15 = vector.broadcast %1 : f32 to vector<1x512xf32>
    %16 = arith.addf %14, %15 : vector<1x512xf32>
    %c0_12 = arith.constant 0 : index
    %c0_13 = arith.constant 0 : index
    %17 = vector.load %arg6[%c0_12, %c0_13] : memref<1x512xf32, #tpu.memory_space<vmem>>, vector<1x512xf32>
    tpu.vector_store %arg6[%c0_12, %c0_13], %16 {strides = array<i32>} : memref<1x512xf32, #tpu.memory_space<vmem>>, vector<1x512xf32>,
    return
  }
  func.func @transform_0(%arg0: i32) -> (i32, i32) {
    %c0_i32 = arith.constant 0 : i32
    %c0_i32_0 = arith.constant 0 : i32
    %c0_i32_1 = arith.constant 0 : i32
    return %c0_i32, %c0_i32_0 : i32, i32
  }
  func.func @transform_1(%arg0: i32) -> (i32, i32) {
    %c0_i32 = arith.constant 0 : i32
    %c0_i32_0 = arith.constant 0 : i32
    return %arg0, %c0_i32 : i32, i32
  }
  func.func @transform_2(%arg0: i32) -> (i32, i32) {
    %c0_i32 = arith.constant 0 : i32
    %c0_i32_0 = arith.constant 0 : i32
    %c0_i32_1 = arith.constant 0 : i32
    return %c0_i32, %c0_i32_0 : i32, i32
  }
  func.func @transform_3(%arg0: i32) -> (i32, i32) {
    %c0_i32 = arith.constant 0 : i32
    %c0_i32_0 = arith.constant 0 : i32
    %c0_i32_1 = arith.constant 0 : i32
    return %c0_i32, %c0_i32_0 : i32, i32
  }
  func.func @transform_4(%arg0: i32) -> (i32, i32) {
    %c0_i32 = arith.constant 0 : i32
    %c0_i32_0 = arith.constant 0 : i32
    %c0_i32_1 = arith.constant 0 : i32
    return %c0_i32, %c0_i32_0 : i32, i32
  }
  func.func @transform_5(%arg0: i32) -> (i32, i32) {
    %c0_i32 = arith.constant 0 : i32
    %c0_i32_0 = arith.constant 0 : i32
    return %c0_i32, %arg0 : i32, i32
  }
}

</mosaic_0001>

<bundles_post_ra>
// kernel: tpu_custom_call.1
= control target key start
LH: loop header
LB: loop body
LE: loop exit
PB: predicated region body
PF: predicated region fallthrough
CT: control target
= control target key end

     0   :  { %10 = vsyncpa [#allocation4], 0  ;;  %s2388_s0 = inlined_call_operand.vmem [shape: f32[1,2], index: 0, kind: input, shape index: {}]   ;;  %s2389_s1 = inlined_call_operand.vmem [shape: bf16[1024,64], index: 1, kind: input, shape index: {}]   ;;  %s2390_s2 = inlined_call_operand.vmem [shape: bf16[64,128], index: 2, kind: input, shape index: {}]   ;;  %s2391_s3 = inlined_call_operand.vmem [shape: f32[1,128], index: 3, kind: input, shape index: {}]   ;;  %s2392_s4 = inlined_call_operand.vmem [shape: f32[1,128], index: 4, kind: input, shape index: {}]   ;;  %s2393_s5 = inlined_call_operand.hbm [shape: f32[1,1024], index: 5, kind: output, shape index: {}]  }
   0x1   :  { %11 = vsyncpa [#allocation3], 0 }
   0x2   :  { %13 = vsyncpa [#allocation3 + $0x1], 0  ;;  %s1877_s18 = smov 0   ;;  %s1879_s19 = smov 0  }
   0x3   :  { %s1881_s20 = smov 0   ;;  %s1883_s21 = smov 0  }
   0x4 LB: > { %s1898_s22 = sadd.s32 4294967295, %s1842_s21   ;;  %s1349_s23 = sadd.s32 4294967294, %s1842_s21   ;;  %s1842_s21 = sphi %s1883_s21, %s2400_s21   ;;  %s1838_s20 = sphi %s1881_s20, %s2399_s20   ;;  %s1834_s19 = sphi %s1879_s19, %s2398_s19   ;;  %s1830_s18 = sphi %s1877_s18, %s2397_s18  }
   0x5   : > { %s1902_s24 = sadd.s32 1, %s1842_s21   ;;  %s136_s25 = sadd.s32 1, %s1838_s20 }
   0x6   : > { %s133_s26 = ssub.s32 %s1842_s21, %s1902_s24  ;;  %p146_p0 = scmp.ne.s32.totalorder %s1838_s20, %s1834_s19 }
   0x7   : > { %p134_p1 = scmp.eq.s32.totalorder %s133_s26, 0  ;;  %p147_p2 = scmp.eq.s32.totalorder %s1898_s22, 1 }
   0x8   : > { %p152_p3 = scmp.ne.s32.totalorder %s1834_s19, %s1830_s18  ;;  %p153_p4 = scmp.eq.s32.totalorder %s1349_s23, 1 }
   0x9   : > { %s1913_s27 = scalar_select %p134_p1, %s1838_s20, %s136_s25  }
   0xa   : > { %p1915_p5 = por %p147_p2, %p146_p0  ;;  %p1919_p6 = por %p153_p4, %p152_p3 }
   0xb   : > { %p1350_p7 = scmp.ge.s32.totalorder %s1842_s21, 1  ;;  %p160_p8 = scmp.lt.s32.totalorder %s1842_s21, 3 }
   0xc   : > { %p1688_p9 = scmp.eq.s32.totalorder %s1898_s22, 0  ;;  %s173_s8 = sshll.u32 %s2388_s0, 4  ;;  %s174_s8 = int_to_ptr.vmem [resolvable:$true] %s173_s8 }
   0xd   : > { %p1926_p10 = pnand %p1350_p7, %p160_p8  ;;  %s1761_s9 = scalar_lea.vmem %s174_s8, 16 }
   0xe   : > { %p1762_p13 = scmp.ne.s32.totalorder %s174_s8, %s1761_s9  ;;  %p1769_p3 = scmp.lt.s32.totalorder %s174_s8, %s174_s8 }
   0xf   : > { %p1680_p11 = pneg %p1926_p10  ;;  %p1770_p4 = scmp.lt.s32.totalorder %s1761_s9, %s1761_s9 }
  0x11   : > { %p1681_p12 = pnand %p1688_p9, %p1680_p11  ;;  %p1771_p7 = por %p1770_p4, %p1769_p3 }
  0x13   : > { %p1763_p0 = pneg %p1681_p12 }
  0x15   : > { %p1764_p1 = pnand %p1763_p0, %p1762_p13 }
  0x17   : > { %p1765_p2 = pneg %p1764_p1 }
  0x19   : > { %p1772_p8 = pnand %p1771_p7, %p1765_p2 }
  0x1b   : > { %1775 = shalt.err (!%p1772_p8)
}
  0x1c   : > { %s1844_s10 = smov [#allocation2]   ;;  %204 = sbr.rel (%p1926_p10) target bundleno = 674 (0x2a2), region = 40 }
  0x1d   : > { %1683 = dma.vmem_to_smem (!%p1681_p12), %s174_s8, 16, %s1844_s10, [#allocation4]  }
  0x23   : > { %1821 = dma.done.wait (%p1688_p9), [#allocation4], 16  }
  0x24   : > { %1823 = vsyncadd (%p1688_p9), [#allocation4], 4294967280 }
  0x25   : > { %210 = sfence }
  0x26   : > { %v1725_v0 = vld [vmem:[%s2390_s2] sm:$0xff]   ;;  %s1947_s13 = sshll.u32 %s1898_s22, 6  ;;  %v1726_v1 = vld [vmem:[%s2390_s2 + $0x8] sm:$0xff]   ;;  %v1727_v2 = vld [vmem:[%s2390_s2 + $0x10] sm:$0xff]   ;;  %vm506_vm0 = vcmask 523264   ;;  %s241_s10 = sld [smem:[#allocation2]] }
  0x27   : > { %p234_p10 = scmp.lt.s32.totalorder %s1947_s13, 127  ;;  %1538 = vmatprep.subr.bf16.mxu0 %v1725_v0  ;;  %v1728_v4 = vld [vmem:[%s2390_s2 + $0x18] sm:$0xff]   ;;  %v2032_v36 = vld [vmem:[%s2392_s4] sm:$0x1]  ;;  %s1358_s14 = sld [smem:[#allocation2 + $0x1]] }
  0x28   : > { %1539 = vmatpush3.bf16.msra.mxu0 %v1725_v0  ;;  %1502 = vmatprep.mubr.f32.mxu1 %v2032_v36  ;;  %v2038_v37 = vld [vmem:[%s2391_s3] ss:$0 sm:$0xff]  ;;  %s230_s15 = sand.u32 1, %s1834_s19   ;;  %s2346_s30 = scalar_lea.hbm %s2393_s5, %s1947_s13 }
  0x29   : > { %s235_s16 = scalar_select %p234_p10, %s1947_s13, 127  ;;  %1540 = vmatprep.subr.bf16.mxu0 %v1726_v1 }
  0x2a   : > { %s1846_s7 = smov [#allocation5]  }
  0x2b   : > { %s1357_s25 = sshll.u32 %s235_s16, 2  ;;  %s1355_s16 = sshll.u32 %s230_s15, 2 }
  0x2c   : > { %s1960_s22 = scalar_lea.vmem %s2389_s1, %s1357_s25  ;;  %1541 = vmatpush3.bf16.msra.mxu0 %v1726_v1  ;;  %v2040_v39 = vstv %s241_s10  ;;  %s232_s17 = scalar_lea.vmem [#allocation5], %s1355_s16 }
  0x2d   : > { %v1729_v3 = vld [vmem:[%s1960_s22] sm:$0xff]   ;;  %1542 = vmatprep.subr.bf16.mxu0 %v1727_v2  ;;  %v1730_v5 = vld [vmem:[%s1960_s22 + $0x8] sm:$0xff]   ;;  %v1731_v6 = vld [vmem:[%s1960_s22 + $0x10] sm:$0xff]   ;;  %s1278_s23 = sshll.u32 %s232_s17, 4  ;;  %s1780_s8 = sshll.u32 %s1846_s7, 4  ;;  %s2348_s23 = int_to_ptr.vmem [resolvable:$true] %s1278_s23  ;;  %s1781_s8 = int_to_ptr.vmem [resolvable:$false] %s1780_s8 }
  0x2e   : > { %1546 = vmatprep.mubr.msk.bf16.mxu0 %vm506_vm0, %v1729_v3  ;;  %v1732_v7 = vld [vmem:[%s1960_s22 + $0x18] sm:$0xff]   ;;  %v1733_v8 = vld [vmem:[%s1960_s22 + $0x20] sm:$0xff]   ;;  %v1734_v9 = vld [vmem:[%s1960_s22 + $0x28] sm:$0xff]   ;;  %s1776_s6 = scalar_lea.vmem %s2348_s23, 64  ;;  %s1782_s9 = scalar_lea.vmem %s1781_s8, 128 }
  0x2f   : > { %v1735_v10 = vld [vmem:[%s1960_s22 + $0x30] sm:$0xff]   ;;  %v1736_v11 = vld [vmem:[%s1960_s22 + $0x38] sm:$0xff]   ;;  %v1737_v12 = vld [vmem:[%s1960_s22 + $0x40] sm:$0xff]   ;;  %p1777_p9 = scmp.ne.s32.totalorder %s2348_s23, %s1776_s6  ;;  %p1783_p13 = scmp.lt.s32.totalorder %s2348_s23, %s1781_s8 }
  0x30   : > { %1543 = vmatpush3.bf16.msra.mxu0 %v1727_v2  ;;  %v1738_v13 = vld [vmem:[%s1960_s22 + $0x48] sm:$0xff]   ;;  %v1739_v14 = vld [vmem:[%s1960_s22 + $0x50] sm:$0xff]   ;;  %v1740_v15 = vld [vmem:[%s1960_s22 + $0x58] sm:$0xff]   ;;  %p1784_p0 = scmp.lt.s32.totalorder %s1782_s9, %s1776_s6 }
  0x31   : > { %1544 = vmatprep.subr.bf16.mxu0 %v1728_v4  ;;  %v1741_v16 = vld [vmem:[%s1960_s22 + $0x60] sm:$0xff]   ;;  %v1742_v17 = vld [vmem:[%s1960_s22 + $0x68] sm:$0xff]   ;;  %v1743_v18 = vld [vmem:[%s1960_s22 + $0x70] sm:$0xff]   ;;  %p1778_p11 = pnand %p1777_p9, %p1915_p5 }
  0x32   : > { %v1744_v19 = vld [vmem:[%s1960_s22 + $0x78] sm:$0xff]   ;;  %v1745_v20 = vld [vmem:[%s1960_s22 + $0x80] sm:$0xff]   ;;  %v1746_v21 = vld [vmem:[%s1960_s22 + $0x88] sm:$0xff]   ;;  %p1785_p1 = por %p1784_p0, %p1783_p13 }
  0x33   : > { %v1747_v22 = vld [vmem:[%s1960_s22 + $0x90] sm:$0xff]   ;;  %v1748_v23 = vld [vmem:[%s1960_s22 + $0x98] sm:$0xff]   ;;  %v1749_v24 = vld [vmem:[%s1960_s22 + $0xa0] sm:$0xff]   ;;  %p1779_p12 = pneg %p1778_p11 }
  0x34   : > { %1545 = vmatpush3.bf16.msra.mxu0 %v1728_v4  ;;  %v1750_v25 = vld [vmem:[%s1960_s22 + $0xa8] sm:$0xff]   ;;  %v1751_v26 = vld [vmem:[%s1960_s22 + $0xb0] sm:$0xff]   ;;  %v1752_v27 = vld [vmem:[%s1960_s22 + $0xb8] sm:$0xff]  }
  0x35   : > { %v1753_v28 = vld [vmem:[%s1960_s22 + $0xc0] sm:$0xff]   ;;  %v1754_v29 = vld [vmem:[%s1960_s22 + $0xc8] sm:$0xff]   ;;  %v1755_v30 = vld [vmem:[%s1960_s22 + $0xd0] sm:$0xff]   ;;  %p1786_p2 = pnand %p1785_p1, %p1779_p12 }
  0x36   : > { %v1756_v31 = vld [vmem:[%s1960_s22 + $0xd8] sm:$0xff]   ;;  %v1757_v32 = vld [vmem:[%s1960_s22 + $0xe0] sm:$0xff]   ;;  %v1758_v33 = vld [vmem:[%s1960_s22 + $0xe8] sm:$0xff]  }
  0x37   : > { %1547 = vmatmul.mubr.msk.bf16.vlgmr.msra.gmra.mrb[0].mxu0 %vm506_vm0, %v1730_v5  ;;  %v1759_v34 = vld [vmem:[%s1960_s22 + $0xf0] sm:$0xff]   ;;  %v1760_v35 = vld [vmem:[%s1960_s22 + $0xf8] sm:$0xff]   ;;  %s1264_s22 = scalar_lea.sflag [#allocation3], %s230_s15 }
  0x38   : > { %1550 = vmatprep.mubr.msk.bf16.mxu0 %vm506_vm0, %v1731_v6 }
  0x3f   : > { %1551 = vmatmul.mubr.msk.bf16.gmra.mrb[4].mxu0 %vm506_vm0, %v1732_v7 }
  0x40   : > { %1554 = vmatprep.mubr.msk.bf16.mxu0 %vm506_vm0, %v1733_v8 }
  0x47   : > { %1555 = vmatmul.mubr.msk.bf16.gmra.mrb[8].mxu0 %vm506_vm0, %v1734_v9 }
  0x48   : > { %1558 = vmatprep.mubr.msk.bf16.mxu0 %vm506_vm0, %v1735_v10 }
  0x4f   : > { %1559 = vmatmul.mubr.msk.bf16.gmra.mrb[12].mxu0 %vm506_vm0, %v1736_v11 }
  0x50   : > { %1562 = vmatprep.mubr.msk.bf16.mxu0 %vm506_vm0, %v1737_v12 }
  0x57   : > { %1563 = vmatmul.mubr.msk.bf16.gmra.mrb[16].mxu0 %vm506_vm0, %v1738_v13 }
  0x58   : > { %1566 = vmatprep.mubr.msk.bf16.mxu0 %vm506_vm0, %v1739_v14 }
  0x5f   : > { %1567 = vmatmul.mubr.msk.bf16.gmra.mrb[20].mxu0 %vm506_vm0, %v1740_v15 }
  0x60   : > { %1570 = vmatprep.mubr.msk.bf16.mxu0 %vm506_vm0, %v1741_v16 }
  0x67   : > { %1571 = vmatmul.mubr.msk.bf16.gmra.mrb[24].mxu0 %vm506_vm0, %v1742_v17 }
  0x68   : > { %1574 = vmatprep.mubr.msk.bf16.mxu0 %vm506_vm0, %v1743_v18 }
  0x6f   : > { %1575 = vmatmul.mubr.msk.bf16.gmra.mrb[28].mxu0 %vm506_vm0, %v1744_v19 }
  0x70   : > { %1578 = vmatprep.mubr.msk.bf16.mxu0 %vm506_vm0, %v1745_v20 }
  0x77   : > { %1579 = vmatmul.mubr.msk.bf16.gmra.mrb[32].mxu0 %vm506_vm0, %v1746_v21 }
  0x78   : > { %1582 = vmatprep.mubr.msk.bf16.mxu0 %vm506_vm0, %v1747_v22 }
  0x7f   : > { %1583 = vmatmul.mubr.msk.bf16.gmra.mrb[36].mxu0 %vm506_vm0, %v1748_v23 }
  0x80   : > { %1586 = vmatprep.mubr.msk.bf16.mxu0 %vm506_vm0, %v1749_v24 }
  0x87   : > { %1587 = vmatmul.mubr.msk.bf16.gmra.mrb[40].mxu0 %vm506_vm0, %v1750_v25 }
  0x88   : > { %1590 = vmatprep.mubr.msk.bf16.mxu0 %vm506_vm0, %v1751_v26 }
  0x8f   : > { %1591 = vmatmul.mubr.msk.bf16.gmra.mrb[44].mxu0 %vm506_vm0, %v1752_v27 }
  0x90   : > { %1594 = vmatprep.mubr.msk.bf16.mxu0 %vm506_vm0, %v1753_v28 }
  0x97   : > { %1595 = vmatmul.mubr.msk.bf16.gmra.mrb[48].mxu0 %vm506_vm0, %v1754_v29 }
  0x98   : > { %1598 = vmatprep.mubr.msk.bf16.mxu0 %vm506_vm0, %v1755_v30 }
  0x9f   : > { %1599 = vmatmul.mubr.msk.bf16.gmra.mrb[52].mxu0 %vm506_vm0, %v1756_v31 }
  0xa0   : > { %1602 = vmatprep.mubr.msk.bf16.mxu0 %vm506_vm0, %v1757_v32 }
  0xa7   : > { %1603 = vmatmul.mubr.msk.bf16.gmra.mrb[56].mxu0 %vm506_vm0, %v1758_v33 }
  0xa8   : > { %1606 = vmatprep.mubr.msk.bf16.mxu0 %vm506_vm0, %v1759_v34 }
  0xaf   : > { %1607 = vmatmul.mubr.msk.bf16.gmra.mrb[60].mxu0 %vm506_vm0, %v1760_v35 }
 0x10a   : > { %v1548_v38 = vpop.f32.mrb[0].mxu0 }
 0x10b   : > { %v646_v40 = vadd.f32 %v1548_v38, %v2038_v37  ;;  %v637_v41 = vpop.f32.mrb[1].mxu0 }
 0x10c   : > { %v638_v42 = vadd.f32 %v2038_v37, %v637_v41  ;;  %v1549_v43 = vpop.f32.mrb[2].mxu0 }
 0x10d   : > { %v959_v44 = vmul.f32 %v2040_v39, %v646_v40  ;;  %v649_v45 = vadd.f32 %v1549_v43, %v2038_v37  ;;  %v640_v46 = vpop.f32.mrb[3].mxu0  ;;  %vm894_vm1 = vcmp.ge.f32.partialorder %v646_v40, 0.0 }
 0x10e   : > { %v957_v47 = vmul.f32 %v2040_v39, %v638_v42  ;;  %v641_v48 = vadd.f32 %v2038_v37, %v640_v46  ;;  %vm892_vm3 = vcmp.ge.f32.partialorder %v638_v42, 0.0 }
 0x10f   : > { %vm895_vm2 = vcmp.ge.f32.partialorder %v649_v45, 0.0  ;;  %v960_v49 = vmul.f32 %v2040_v39, %v649_v45  ;;  %v2050_v51 = vsel %vm894_vm1, %v646_v40, %v959_v44 }
 0x110   : > { %v958_v50 = vmul.f32 %v2040_v39, %v641_v48  ;;  %vm893_vm4 = vcmp.ge.f32.partialorder %v641_v48, 0.0  ;;  %v2054_v54 = vsel %vm892_vm3, %v638_v42, %v957_v47 }
 0x111   : > { %v2052_v52 = vsel %vm895_vm2, %v649_v45, %v960_v49 }
 0x112   : > { %v1552_v53 = vpop.f32.mrb[4].mxu0  ;;  %v2056_v55 = vsel %vm893_vm4, %v641_v48, %v958_v50  ;;  %v1616_v56 = vpack.c.bf16 %v2052_v52, %v2050_v51 }
 0x113   : > { %v662_v57 = vadd.f32 %v1552_v53, %v2038_v37  ;;  %v653_v58 = vpop.f32.mrb[5].mxu0  ;;  %v1612_v59 = vpack.c.bf16 %v2056_v55, %v2054_v54 }
 0x114   : > { %v654_v60 = vadd.f32 %v2038_v37, %v653_v58  ;;  %v1553_v61 = vpop.f32.mrb[6].mxu0 }
 0x115   : > { %v963_v62 = vmul.f32 %v2040_v39, %v662_v57  ;;  %v665_v63 = vadd.f32 %v1553_v61, %v2038_v37  ;;  %v656_v0 = vpop.f32.mrb[7].mxu0  ;;  %vm898_vm5 = vcmp.ge.f32.partialorder %v662_v57, 0.0 }
 0x116   : > { %v961_v1 = vmul.f32 %v2040_v39, %v654_v60  ;;  %v657_v2 = vadd.f32 %v2038_v37, %v656_v0  ;;  %vm896_vm6 = vcmp.ge.f32.partialorder %v654_v60, 0.0 }
 0x117   : > { %vm899_vm7 = vcmp.ge.f32.partialorder %v665_v63, 0.0  ;;  %v964_v3 = vmul.f32 %v2040_v39, %v665_v63  ;;  %v2070_v5 = vsel %vm898_vm5, %v662_v57, %v963_v62 }
 0x118   : > { %vm897_vm8 = vcmp.ge.f32.partialorder %v657_v2, 0.0  ;;  %v962_v4 = vmul.f32 %v2040_v39, %v657_v2  ;;  %v2074_v8 = vsel %vm896_vm6, %v654_v60, %v961_v1 }
 0x119   : > { %v2072_v6 = vsel %vm899_vm7, %v665_v63, %v964_v3 }
 0x11a   : > { %v1556_v7 = vpop.f32.mrb[8].mxu0  ;;  %v2076_v9 = vsel %vm897_vm8, %v657_v2, %v962_v4  ;;  %v1624_v10 = vpack.c.bf16 %v2072_v6, %v2070_v5 }
 0x11b   : > { %v678_v11 = vadd.f32 %v1556_v7, %v2038_v37  ;;  %v669_v12 = vpop.f32.mrb[9].mxu0  ;;  %v1620_v13 = vpack.c.bf16 %v2076_v9, %v2074_v8 }
 0x11c   : > { %v670_v14 = vadd.f32 %v2038_v37, %v669_v12  ;;  %v1557_v15 = vpop.f32.mrb[10].mxu0 }
 0x11d   : > { %v967_v16 = vmul.f32 %v2040_v39, %v678_v11  ;;  %v681_v17 = vadd.f32 %v1557_v15, %v2038_v37  ;;  %v672_v18 = vpop.f32.mrb[11].mxu0  ;;  %vm902_vm9 = vcmp.ge.f32.partialorder %v678_v11, 0.0 }
 0x11e   : > { %v965_v19 = vmul.f32 %v2040_v39, %v670_v14  ;;  %v673_v20 = vadd.f32 %v2038_v37, %v672_v18  ;;  %vm900_vm10 = vcmp.ge.f32.partialorder %v670_v14, 0.0 }
 0x11f   : > { %vm903_vm11 = vcmp.ge.f32.partialorder %v681_v17, 0.0  ;;  %v968_v21 = vmul.f32 %v2040_v39, %v681_v17  ;;  %v2090_v23 = vsel %vm902_vm9, %v678_v11, %v967_v16 }
 0x120   : > { %vm901_vm12 = vcmp.ge.f32.partialorder %v673_v20, 0.0  ;;  %v966_v22 = vmul.f32 %v2040_v39, %v673_v20  ;;  %v2094_v26 = vsel %vm900_vm10, %v670_v14, %v965_v19 }
 0x121   : > { %v2092_v24 = vsel %vm903_vm11, %v681_v17, %v968_v21 }
 0x122   : > { %v1560_v25 = vpop.f32.mrb[12].mxu0  ;;  %v2096_v27 = vsel %vm901_vm12, %v673_v20, %v966_v22  ;;  %v1632_v28 = vpack.c.bf16 %v2092_v24, %v2090_v23 }
 0x123   : > { %v694_v29 = vadd.f32 %v1560_v25, %v2038_v37  ;;  %v685_v30 = vpop.f32.mrb[13].mxu0  ;;  %v1628_v31 = vpack.c.bf16 %v2096_v27, %v2094_v26 }
 0x124   : > { %v686_v32 = vadd.f32 %v2038_v37, %v685_v30  ;;  %v1561_v33 = vpop.f32.mrb[14].mxu0 }
 0x125   : > { %v971_v34 = vmul.f32 %v2040_v39, %v694_v29  ;;  %v697_v35 = vadd.f32 %v1561_v33, %v2038_v37  ;;  %v688_v38 = vpop.f32.mrb[15].mxu0  ;;  %vm906_vm13 = vcmp.ge.f32.partialorder %v694_v29, 0.0 }
 0x126   : > { %v969_v40 = vmul.f32 %v2040_v39, %v686_v32  ;;  %v689_v41 = vadd.f32 %v2038_v37, %v688_v38  ;;  %vm904_vm14 = vcmp.ge.f32.partialorder %v686_v32, 0.0 }
 0x127   : > { %vm907_vm15 = vcmp.ge.f32.partialorder %v697_v35, 0.0  ;;  %v972_v42 = vmul.f32 %v2040_v39, %v697_v35  ;;  %v2110_v44 = vsel %vm906_vm13, %v694_v29, %v971_v34 }
 0x128   : > { %vm905_vm0 = vcmp.ge.f32.partialorder %v689_v41, 0.0  ;;  %v970_v43 = vmul.f32 %v2040_v39, %v689_v41  ;;  %v2114_v47 = vsel %vm904_vm14, %v686_v32, %v969_v40 }
 0x129   : > { %v2112_v45 = vsel %vm907_vm15, %v697_v35, %v972_v42 }
 0x12a   : > { %v1564_v46 = vpop.f32.mrb[16].mxu0  ;;  %v2116_v48 = vsel %vm905_vm0, %v689_v41, %v970_v43  ;;  %v1640_v49 = vpack.c.bf16 %v2112_v45, %v2110_v44 }
 0x12b   : > { %v710_v50 = vadd.f32 %v1564_v46, %v2038_v37  ;;  %v701_v53 = vpop.f32.mrb[17].mxu0  ;;  %v1636_v57 = vpack.c.bf16 %v2116_v48, %v2114_v47 }
 0x12c   : > { %v702_v58 = vadd.f32 %v2038_v37, %v701_v53  ;;  %v1565_v60 = vpop.f32.mrb[18].mxu0 }
 0x12d   : > { %v975_v61 = vmul.f32 %v2040_v39, %v710_v50  ;;  %v713_v62 = vadd.f32 %v1565_v60, %v2038_v37  ;;  %v704_v63 = vpop.f32.mrb[19].mxu0  ;;  %vm910_vm1 = vcmp.ge.f32.partialorder %v710_v50, 0.0 }
 0x12e   : > { %v973_v0 = vmul.f32 %v2040_v39, %v702_v58  ;;  %v705_v1 = vadd.f32 %v2038_v37, %v704_v63  ;;  %vm908_vm3 = vcmp.ge.f32.partialorder %v702_v58, 0.0 }
 0x12f   : > { %vm911_vm2 = vcmp.ge.f32.partialorder %v713_v62, 0.0  ;;  %v976_v2 = vmul.f32 %v2040_v39, %v713_v62  ;;  %v1039_v4 = vsel %vm910_vm1, %v710_v50, %v975_v61 }
 0x130   : > { %v974_v3 = vmul.f32 %v2040_v39, %v705_v1  ;;  %vm909_vm4 = vcmp.ge.f32.partialorder %v705_v1, 0.0  ;;  %v1037_v12 = vsel %vm908_vm3, %v702_v58, %v973_v0 }
 0x131   : > { %v1040_v7 = vsel %vm911_vm2, %v713_v62, %v976_v2 }
 0x132   : > { %v1568_v11 = vpop.f32.mrb[20].mxu0  ;;  %v1038_v14 = vsel %vm909_vm4, %v705_v1, %v974_v3  ;;  %v1614_v15 = vpack.c.bf16 %v1040_v7, %v1039_v4 }
 0x133   : > { %v726_v16 = vadd.f32 %v1568_v11, %v2038_v37  ;;  %v717_v17 = vpop.f32.mrb[21].mxu0  ;;  %v1610_v18 = vpack.c.bf16 %v1038_v14, %v1037_v12 }
 0x134   : > { %v718_v19 = vadd.f32 %v2038_v37, %v717_v17  ;;  %v1569_v20 = vpop.f32.mrb[22].mxu0 }
 0x135   : > { %v979_v21 = vmul.f32 %v2040_v39, %v726_v16  ;;  %v729_v22 = vadd.f32 %v1569_v20, %v2038_v37  ;;  %v720_v25 = vpop.f32.mrb[23].mxu0  ;;  %1611 = vmatprep.subr.bf16.mxu1 %v1610_v18  ;;  %vm914_vm5 = vcmp.ge.f32.partialorder %v726_v16, 0.0 }
 0x136   : > { %v977_v29 = vmul.f32 %v2040_v39, %v718_v19  ;;  %v721_v30 = vadd.f32 %v2038_v37, %v720_v25  ;;  %1613 = vmatpush3.bf16.xpose.msra.mxu1 %v1612_v59  ;;  %vm912_vm6 = vcmp.ge.f32.partialorder %v718_v19, 0.0 }
 0x137   : > { %vm915_vm7 = vcmp.ge.f32.partialorder %v729_v22, 0.0  ;;  %v980_v32 = vmul.f32 %v2040_v39, %v729_v22  ;;  %1615 = vmatprep.subr.bf16.mxu1 %v1614_v15  ;;  %v1043_v34 = vsel %vm914_vm5, %v726_v16, %v979_v21 }
 0x138   : > { %vm913_vm8 = vcmp.ge.f32.partialorder %v721_v30, 0.0  ;;  %v978_v33 = vmul.f32 %v2040_v39, %v721_v30  ;;  %v1041_v40 = vsel %vm912_vm6, %v718_v19, %v977_v29 }
 0x139   : > { %v1044_v35 = vsel %vm915_vm7, %v729_v22, %v980_v32 }
 0x13a   : > { %v1572_v38 = vpop.f32.mrb[24].mxu0  ;;  %v1042_v41 = vsel %vm913_vm8, %v721_v30, %v978_v33  ;;  %v1622_v42 = vpack.c.bf16 %v1044_v35, %v1043_v34 }
 0x13b   : > { %v742_v43 = vadd.f32 %v1572_v38, %v2038_v37  ;;  %v733_v46 = vpop.f32.mrb[25].mxu0  ;;  %v1618_v50 = vpack.c.bf16 %v1042_v41, %v1041_v40 }
 0x13c   : > { %v734_v54 = vadd.f32 %v2038_v37, %v733_v46  ;;  %v1573_v55 = vpop.f32.mrb[26].mxu0 }
 0x13d   : > { %v983_v59 = vmul.f32 %v2040_v39, %v742_v43  ;;  %v745_v53 = vadd.f32 %v1573_v55, %v2038_v37  ;;  %v736_v58 = vpop.f32.mrb[27].mxu0  ;;  %vm918_vm9 = vcmp.ge.f32.partialorder %v742_v43, 0.0 }
 0x13e   : > { %v981_v60 = vmul.f32 %v2040_v39, %v734_v54  ;;  %v737_v61 = vadd.f32 %v2038_v37, %v736_v58  ;;  %1617 = vmatpush3.bf16.xpose.msra.mxu1 %v1616_v56  ;;  %vm916_vm10 = vcmp.ge.f32.partialorder %v734_v54, 0.0 }
 0x13f   : > { %vm919_vm11 = vcmp.ge.f32.partialorder %v745_v53, 0.0  ;;  %v984_v62 = vmul.f32 %v2040_v39, %v745_v53  ;;  %1619 = vmatprep.subr.bf16.mxu1 %v1618_v50  ;;  %v2152_v0 = vsel %vm918_vm9, %v742_v43, %v983_v59 }
 0x140   : > { %vm917_vm12 = vcmp.ge.f32.partialorder %v737_v61, 0.0  ;;  %v982_v63 = vmul.f32 %v2040_v39, %v737_v61  ;;  %v1045_v3 = vsel %vm916_vm10, %v734_v54, %v981_v60 }
 0x141   : > { %v2154_v1 = vsel %vm919_vm11, %v745_v53, %v984_v62 }
 0x142   : > { %v1576_v2 = vpop.f32.mrb[28].mxu0  ;;  %v1046_v4 = vsel %vm917_vm12, %v737_v61, %v982_v63  ;;  %v1630_v7 = vpack.c.bf16 %v2154_v1, %v2152_v0 }
 0x143   : > { %v758_v51 = vadd.f32 %v1576_v2, %v2038_v37  ;;  %v749_v52 = vpop.f32.mrb[29].mxu0  ;;  %v1626_v56 = vpack.c.bf16 %v1046_v4, %v1045_v3 }
 0x144   : > { %v750_v11 = vadd.f32 %v2038_v37, %v749_v52  ;;  %v1577_v12 = vpop.f32.mrb[30].mxu0 }
 0x145   : > { %v987_v14 = vmul.f32 %v2040_v39, %v758_v51  ;;  %v761_v15 = vadd.f32 %v1577_v12, %v2038_v37  ;;  %v752_v16 = vpop.f32.mrb[31].mxu0  ;;  %vm922_vm13 = vcmp.ge.f32.partialorder %v758_v51, 0.0 }
 0x146   : > { %v985_v17 = vmul.f32 %v2040_v39, %v750_v11  ;;  %v753_v18 = vadd.f32 %v2038_v37, %v752_v16  ;;  %1621 = vmatpush3.bf16.xpose.msra.mxu1 %v1620_v13  ;;  %vm920_vm14 = vcmp.ge.f32.partialorder %v750_v11, 0.0 }
 0x147   : > { %vm923_vm15 = vcmp.ge.f32.partialorder %v761_v15, 0.0  ;;  %v988_v19 = vmul.f32 %v2040_v39, %v761_v15  ;;  %1623 = vmatprep.subr.bf16.mxu1 %v1622_v42  ;;  %v2169_v21 = vsel %vm922_vm13, %v758_v51, %v987_v14 }
 0x148   : > { %vm921_vm0 = vcmp.ge.f32.partialorder %v753_v18, 0.0  ;;  %v986_v20 = vmul.f32 %v2040_v39, %v753_v18  ;;  %v2173_v29 = vsel %vm920_vm14, %v750_v11, %v985_v17 }
 0x149   : > { %v2171_v22 = vsel %vm923_vm15, %v761_v15, %v988_v19 }
 0x14a   : > { %v1580_v25 = vpop.f32.mrb[32].mxu0  ;;  %v2175_v30 = vsel %vm921_vm0, %v753_v18, %v986_v20  ;;  %v1638_v8 = vpack.c.bf16 %v2171_v22, %v2169_v21 }
 0x14b   : > { %v774_v9 = vadd.f32 %v1580_v25, %v2038_v37  ;;  %v765_v13 = vpop.f32.mrb[33].mxu0  ;;  %v1634_v32 = vpack.c.bf16 %v2175_v30, %v2173_v29 }
 0x14c   : > { %v766_v33 = vadd.f32 %v2038_v37, %v765_v13  ;;  %v1581_v34 = vpop.f32.mrb[34].mxu0 }
 0x14d   : > { %v991_v35 = vmul.f32 %v2040_v39, %v774_v9  ;;  %v777_v38 = vadd.f32 %v1581_v34, %v2038_v37  ;;  %v768_v40 = vpop.f32.mrb[35].mxu0  ;;  %vm926_vm1 = vcmp.ge.f32.partialorder %v774_v9, 0.0 }
 0x14e   : > { %v989_v41 = vmul.f32 %v2040_v39, %v766_v33  ;;  %v769_v42 = vadd.f32 %v2038_v37, %v768_v40  ;;  %1625 = vmatpush3.bf16.xpose.msra.mxu1 %v1624_v10  ;;  %vm924_vm2 = vcmp.ge.f32.partialorder %v766_v33, 0.0 }
 0x14f   : > { %vm927_vm3 = vcmp.ge.f32.partialorder %v777_v38, 0.0  ;;  %v992_v43 = vmul.f32 %v2040_v39, %v777_v38  ;;  %1627 = vmatprep.subr.bf16.mxu1 %v1626_v56  ;;  %v2192_v50 = vsel %vm926_vm1, %v774_v9, %v991_v35 }
 0x150   : > { %vm925_vm4 = vcmp.ge.f32.partialorder %v769_v42, 0.0  ;;  %v990_v46 = vmul.f32 %v2040_v39, %v769_v42  ;;  %v2196_v55 = vsel %vm924_vm2, %v766_v33, %v989_v41 }
 0x151   : > { %v2194_v54 = vsel %vm927_vm3, %v777_v38, %v992_v43 }
 0x152   : > { %v1648_v59 = vpack.c.bf16 %v2194_v54, %v2192_v50  ;;  %v2200_v53 = vsel %vm925_vm4, %v769_v42, %v990_v46  ;;  %v1584_v5 = vpop.f32.mrb[36].mxu0 }
 0x153   : > { %v1644_v6 = vpack.c.bf16 %v2200_v53, %v2196_v55  ;;  %v790_v10 = vadd.f32 %v1584_v5, %v2038_v37  ;;  %v781_v58 = vpop.f32.mrb[37].mxu0 }
 0x154   : > { %v782_v60 = vadd.f32 %v2038_v37, %v781_v58  ;;  %v1585_v61 = vpop.f32.mrb[38].mxu0 }
 0x155   : > { %v995_v62 = vmul.f32 %v2040_v39, %v790_v10  ;;  %v793_v63 = vadd.f32 %v1585_v61, %v2038_v37  ;;  %v784_v2 = vpop.f32.mrb[39].mxu0  ;;  %vm930_vm5 = vcmp.ge.f32.partialorder %v790_v10, 0.0 }
 0x156   : > { %v993_v3 = vmul.f32 %v2040_v39, %v782_v60  ;;  %v785_v4 = vadd.f32 %v2038_v37, %v784_v2  ;;  %1629 = vmatpush3.bf16.xpose.msra.mxu1 %v1628_v31  ;;  %vm928_vm6 = vcmp.ge.f32.partialorder %v782_v60, 0.0 }
 0x157   : > { %vm931_vm7 = vcmp.ge.f32.partialorder %v793_v63, 0.0  ;;  %v996_v51 = vmul.f32 %v2040_v39, %v793_v63  ;;  %1631 = vmatprep.subr.bf16.mxu1 %v1630_v7  ;;  %v2218_v56 = vsel %vm930_vm5, %v790_v10, %v995_v62 }
 0x158   : > { %vm929_vm8 = vcmp.ge.f32.partialorder %v785_v4, 0.0  ;;  %v994_v52 = vmul.f32 %v2040_v39, %v785_v4  ;;  %v2222_v12 = vsel %vm928_vm6, %v782_v60, %v993_v3 }
 0x159   : > { %v2220_v11 = vsel %vm931_vm7, %v793_v63, %v996_v51 }
 0x15a   : > { %v1656_v26 = vpack.c.bf16 %v2220_v11, %v2218_v56  ;;  %v2226_v27 = vsel %vm929_vm8, %v785_v4, %v994_v52  ;;  %v1588_v31 = vpop.f32.mrb[40].mxu0 }
 0x15b   : > { %v1652_v14 = vpack.c.bf16 %v2226_v27, %v2222_v12  ;;  %v806_v0 = vadd.f32 %v1588_v31, %v2038_v37  ;;  %v797_v1 = vpop.f32.mrb[41].mxu0  ;;  %v1845_v27 = vmov 1966171168  }
 0x15c   : > { %v798_v7 = vadd.f32 %v2038_v37, %v797_v1  ;;  %v1589_v15 = vpop.f32.mrb[42].mxu0 }
 0x15d   : > { %v999_v16 = vmul.f32 %v2040_v39, %v806_v0  ;;  %v809_v17 = vadd.f32 %v1589_v15, %v2038_v37  ;;  %v800_v18 = vpop.f32.mrb[43].mxu0  ;;  %vm934_vm9 = vcmp.ge.f32.partialorder %v806_v0, 0.0 }
 0x15e   : > { %v997_v19 = vmul.f32 %v2040_v39, %v798_v7  ;;  %v801_v20 = vadd.f32 %v2038_v37, %v800_v18  ;;  %1633 = vmatpush3.bf16.xpose.msra.mxu1 %v1632_v28  ;;  %vm932_vm10 = vcmp.ge.f32.partialorder %v798_v7, 0.0 }
 0x15f   : > { %vm935_vm11 = vcmp.ge.f32.partialorder %v809_v17, 0.0  ;;  %v1000_v25 = vmul.f32 %v2040_v39, %v809_v17  ;;  %1635 = vmatprep.subr.bf16.mxu1 %v1634_v32  ;;  %v2241_v30 = vsel %vm934_vm9, %v806_v0, %v999_v16 }
 0x160   : > { %vm933_vm12 = vcmp.ge.f32.partialorder %v801_v20, 0.0  ;;  %v998_v29 = vmul.f32 %v2040_v39, %v801_v20  ;;  %v2245_v13 = vsel %vm932_vm10, %v798_v7, %v997_v19 }
 0x161   : > { %v2243_v9 = vsel %vm935_vm11, %v809_v17, %v1000_v25 }
 0x162   : > { %v1664_v33 = vpack.c.bf16 %v2243_v9, %v2241_v30  ;;  %v2249_v34 = vsel %vm933_vm12, %v801_v20, %v998_v29  ;;  %v1592_v23 = vpop.f32.mrb[44].mxu0  ;;  %v1238_v30 = vlaneseq }
 0x163   : > { %v1660_v24 = vpack.c.bf16 %v2249_v34, %v2245_v13  ;;  %v822_v28 = vadd.f32 %v1592_v23, %v2038_v37  ;;  %v813_v32 = vpop.f32.mrb[45].mxu0 }
 0x164   : > { %v814_v35 = vadd.f32 %v2038_v37, %v813_v32  ;;  %v1593_v38 = vpop.f32.mrb[46].mxu0  ;;  %v1239_v13 = vshrl.u32 %v1238_v30, 7 }
 0x165   : > { %v1003_v40 = vmul.f32 %v2040_v39, %v822_v28  ;;  %v825_v41 = vadd.f32 %v1593_v38, %v2038_v37  ;;  %v816_v42 = vpop.f32.mrb[47].mxu0  ;;  %vm938_vm13 = vcmp.ge.f32.partialorder %v822_v28, 0.0 }
 0x166   : > { %v1001_v43 = vmul.f32 %v2040_v39, %v814_v35  ;;  %v817_v46 = vadd.f32 %v2038_v37, %v816_v42  ;;  %1637 = vmatpush3.bf16.xpose.msra.mxu1 %v1636_v57  ;;  %vm936_vm14 = vcmp.ge.f32.partialorder %v814_v35, 0.0 }
 0x167   : > { %vm939_vm15 = vcmp.ge.f32.partialorder %v825_v41, 0.0  ;;  %v1004_v5 = vmul.f32 %v2040_v39, %v825_v41  ;;  %1639 = vmatprep.subr.bf16.mxu1 %v1638_v8  ;;  %v2267_v58 = vsel %vm938_vm13, %v822_v28, %v1003_v40 }
 0x168   : > { %vm937_vm0 = vcmp.ge.f32.partialorder %v817_v46, 0.0  ;;  %v1002_v10 = vmul.f32 %v2040_v39, %v817_v46  ;;  %v2271_v61 = vsel %vm936_vm14, %v814_v35, %v1001_v43 }
 0x169   : > { %v2269_v60 = vsel %vm939_vm15, %v825_v41, %v1004_v5 }
 0x16a   : > { %v1672_v47 = vpack.c.bf16 %v2269_v60, %v2267_v58  ;;  %v2275_v48 = vsel %vm937_vm0, %v817_v46, %v1002_v10  ;;  %v1596_v57 = vpop.f32.mrb[48].mxu0 }
 0x16b   : > { %v1668_v62 = vpack.c.bf16 %v2275_v48, %v2271_v61  ;;  %v838_v21 = vadd.f32 %v1596_v57, %v2038_v37  ;;  %v829_v22 = vpop.f32.mrb[49].mxu0 }
 0x16c   : > { %v830_v8 = vadd.f32 %v2038_v37, %v829_v22  ;;  %v1597_v63 = vpop.f32.mrb[50].mxu0 }
 0x16d   : > { %v1007_v2 = vmul.f32 %v2040_v39, %v838_v21  ;;  %v841_v3 = vadd.f32 %v1597_v63, %v2038_v37  ;;  %v832_v4 = vpop.f32.mrb[51].mxu0  ;;  %vm942_vm1 = vcmp.ge.f32.partialorder %v838_v21, 0.0 }
 0x16e   : > { %v1005_v51 = vmul.f32 %v2040_v39, %v830_v8  ;;  %v833_v52 = vadd.f32 %v2038_v37, %v832_v4  ;;  %1641 = vmatpush3.bf16.xpose.msra.mxu1 %v1640_v49  ;;  %vm940_vm2 = vcmp.ge.f32.partialorder %v830_v8, 0.0 }
 0x16f   : > { %vm943_vm3 = vcmp.ge.f32.partialorder %v841_v3, 0.0  ;;  %v1008_v31 = vmul.f32 %v2040_v39, %v841_v3  ;;  %v1071_v1 = vsel %vm942_vm1, %v838_v21, %v1007_v2  ;;  %vm1260_vm1 = vcmp.lt.s32.totalorder %v1238_v30, 512 }
 0x170   : > { %vm941_vm4 = vcmp.ge.f32.partialorder %v833_v52, 0.0  ;;  %v1006_v0 = vmul.f32 %v2040_v39, %v833_v52  ;;  %v1069_v16 = vsel %vm940_vm2, %v830_v8, %v1005_v51 }
 0x171   : > { %v1072_v7 = vsel %vm943_vm3, %v841_v3, %v1008_v31 }
 0x172   : > { %v1600_v15 = vpop.f32.mrb[52].mxu0  ;;  %v1070_v17 = vsel %vm941_vm4, %v833_v52, %v1006_v0  ;;  %v1646_v18 = vpack.c.bf16 %v1072_v7, %v1071_v1 }
 0x173   : > { %v854_v19 = vadd.f32 %v1600_v15, %v2038_v37  ;;  %v1642_v20 = vpack.c.bf16 %v1070_v17, %v1069_v16  ;;  %v845_v25 = vpop.f32.mrb[53].mxu0 }
 0x174   : > { %v846_v44 = vadd.f32 %v2038_v37, %v845_v25  ;;  %v1601_v45 = vpop.f32.mrb[54].mxu0 }
 0x175   : > { %vm946_vm5 = vcmp.ge.f32.partialorder %v854_v19, 0.0  ;;  %v1011_v49 = vmul.f32 %v2040_v39, %v854_v19  ;;  %1503 = vmatmul.mubr.f32.vlgmr.msra.gmra.mrb[0].mxu1 %v2032_v36  ;;  %1643 = vmatprep.subr.bf16.mxu1 %v1642_v20  ;;  %v857_v29 = vadd.f32 %v1601_v45, %v2038_v37  ;;  %v848_v23 = vpop.f32.mrb[55].mxu0 }
 0x176   : > { %vm944_vm6 = vcmp.ge.f32.partialorder %v846_v44, 0.0  ;;  %v1009_v28 = vmul.f32 %v2040_v39, %v846_v44  ;;  %1645 = vmatpush3.bf16.xpose.msra.mxu1 %v1644_v6  ;;  %v849_v32 = vadd.f32 %v2038_v37, %v848_v23  ;;  %1536 = vmatprep.mubr.f32.mxu1 %v2032_v36 }
 0x177   : > { %vm947_vm7 = vcmp.ge.f32.partialorder %v857_v29, 0.0  ;;  %v1012_v35 = vmul.f32 %v2040_v39, %v857_v29  ;;  %1647 = vmatprep.subr.bf16.mxu1 %v1646_v18  ;;  %v1075_v38 = vsel %vm946_vm5, %v854_v19, %v1011_v49 }
 0x178   : > { %vm945_vm8 = vcmp.ge.f32.partialorder %v849_v32, 0.0  ;;  %v1010_v40 = vmul.f32 %v2040_v39, %v849_v32  ;;  %v1073_v41 = vsel %vm944_vm6, %v846_v44, %v1009_v28 }
 0x179   : > { %v1076_v42 = vsel %vm947_vm7, %v857_v29, %v1012_v35 }
 0x17a   : > { %v1074_v43 = vsel %vm945_vm8, %v849_v32, %v1010_v40  ;;  %v1604_v46 = vpop.f32.mrb[56].mxu0  ;;  %v1654_v5 = vpack.c.bf16 %v1076_v42, %v1075_v38 }
 0x17b   : > { %v1650_v10 = vpack.c.bf16 %v1074_v43, %v1073_v41  ;;  %v870_v55 = vadd.f32 %v1604_v46, %v2038_v37  ;;  %v861_v53 = vpop.f32.mrb[57].mxu0 }
 0x17c   : > { %v862_v6 = vadd.f32 %v2038_v37, %v861_v53  ;;  %v1605_v57 = vpop.f32.mrb[58].mxu0 }
 0x17d   : > { %vm950_vm9 = vcmp.ge.f32.partialorder %v870_v55, 0.0  ;;  %v1015_v21 = vmul.f32 %v2040_v39, %v870_v55  ;;  %v873_v22 = vadd.f32 %v1605_v57, %v2038_v37  ;;  %v864_v8 = vpop.f32.mrb[59].mxu0 }
 0x17e   : > { %1649 = vmatpush3.bf16.xpose.msra.mxu1 %v1648_v59  ;;  %vm948_vm10 = vcmp.ge.f32.partialorder %v862_v6, 0.0  ;;  %v1013_v63 = vmul.f32 %v2040_v39, %v862_v6  ;;  %v865_v2 = vadd.f32 %v2038_v37, %v864_v8 }
 0x17f   : > { %1651 = vmatprep.subr.bf16.mxu1 %v1650_v10  ;;  %vm951_vm11 = vcmp.ge.f32.partialorder %v873_v22, 0.0  ;;  %v1016_v3 = vmul.f32 %v2040_v39, %v873_v22  ;;  %v1079_v4 = vsel %vm950_vm9, %v870_v55, %v1015_v21 }
 0x180   : > { %vm949_vm12 = vcmp.ge.f32.partialorder %v865_v2, 0.0  ;;  %v1014_v51 = vmul.f32 %v2040_v39, %v865_v2  ;;  %v1077_v52 = vsel %vm948_vm10, %v862_v6, %v1013_v63 }
 0x181   : > { %v1080_v31 = vsel %vm951_vm11, %v873_v22, %v1016_v3 }
 0x182   : > { %v1078_v0 = vsel %vm949_vm12, %v865_v2, %v1014_v51  ;;  %v1608_v1 = vpop.f32.mrb[60].mxu0  ;;  %v1662_v7 = vpack.c.bf16 %v1080_v31, %v1079_v4 }
 0x183   : > { %v1658_v50 = vpack.c.bf16 %v1078_v0, %v1077_v52  ;;  %v886_v54 = vadd.f32 %v1608_v1, %v2038_v37  ;;  %v877_v59 = vpop.f32.mrb[61].mxu0 }
 0x184   : > { %v878_v15 = vadd.f32 %v2038_v37, %v877_v59  ;;  %v1609_v16 = vpop.f32.mrb[62].mxu0 }
 0x185   : > { %vm954_vm13 = vcmp.ge.f32.partialorder %v886_v54, 0.0  ;;  %v1019_v17 = vmul.f32 %v2040_v39, %v886_v54  ;;  %v889_v18 = vadd.f32 %v1609_v16, %v2038_v37  ;;  %v880_v19 = vpop.f32.mrb[63].mxu0 }
 0x186   : > { %1653 = vmatpush3.bf16.xpose.msra.mxu1 %v1652_v14  ;;  %vm952_vm14 = vcmp.ge.f32.partialorder %v878_v15, 0.0  ;;  %v1017_v20 = vmul.f32 %v2040_v39, %v878_v15  ;;  %v881_v25 = vadd.f32 %v2038_v37, %v880_v19  ;;  %v1086_v37 = vstv %s1358_s14 }
 0x187   : > { %1655 = vmatprep.subr.bf16.mxu1 %v1654_v5  ;;  %vm955_vm15 = vcmp.ge.f32.partialorder %v889_v18, 0.0  ;;  %v1020_v44 = vmul.f32 %v2040_v39, %v889_v18  ;;  %v1083_v45 = vsel %vm954_vm13, %v886_v54, %v1019_v17  ;;  %v1236_v14 = vunpack.c.l.s4 %v1845_v27 }
 0x188   : > { %vm953_vm0 = vcmp.ge.f32.partialorder %v881_v25, 0.0  ;;  %v1018_v49 = vmul.f32 %v2040_v39, %v881_v25  ;;  %v1081_v29 = vsel %vm952_vm14, %v878_v15, %v1017_v20 }
 0x189   : > { %v1084_v23 = vsel %vm955_vm15, %v889_v18, %v1020_v44  ;;  %v1237_v9 = vunpack.c.0.s8 %v1236_v14 }
 0x18a   : > { %v1082_v28 = vsel %vm953_vm0, %v881_v25, %v1018_v49  ;;  %v1670_v32 = vpack.c.bf16 %v1084_v23, %v1083_v45 }
 0x18b   : > { %v1666_v35 = vpack.c.bf16 %v1082_v28, %v1081_v29  ;;  %v1240_v58 = vsub.s32 %v1237_v9, %v1239_v13 }
 0x18e   : > { %1657 = vmatpush3.bf16.xpose.msra.mxu1 %v1656_v26 }
 0x18f   : > { %1659 = vmatprep.subr.bf16.mxu1 %v1658_v50 }
 0x196   : > { %1661 = vmatpush3.bf16.xpose.msra.mxu1 %v1660_v24 }
 0x197   : > { %1663 = vmatprep.subr.bf16.mxu1 %v1662_v7 }
 0x19e   : > { %1665 = vmatpush3.bf16.xpose.msra.mxu1 %v1664_v33 }
 0x19f   : > { %1667 = vmatprep.subr.bf16.mxu1 %v1666_v35 }
 0x1a6   : > { %1669 = vmatpush3.bf16.xpose.msra.mxu1 %v1668_v62 }
 0x1a7   : > { %1671 = vmatprep.subr.bf16.mxu1 %v1670_v32 }
 0x1ae   : > { %1673 = vmatpush3.bf16.xpose.msra.mxu1 %v1672_v47 }
 0x1b5   : > { %1537 = vmatmul.mubr.f32.vlgmr.msra.gmra.mrb[2].mxu1 %v2032_v36 }
 0x248   : > { %v1153_v39 = vpop.f32.mrb[0].mxu1 }
 0x249   : > { %v1154_v56 = vadd.f32 %v1153_v39, %v1086_v37  ;;  %v1155_v11 = vpop.f32.mrb[1].mxu1 }
 0x24a   : > { %v1156_v12 = vadd.f32 %v1155_v11, %v1086_v37 }
 0x24c   : > { %v1233_v26 = vcombine.low %v1154_v56, %v1156_v12 }
 0x24e   : > { %v1241_v61 = vrot.slane %v1233_v26, %v1240_v58 }
 0x288   : > { %v1224_v33 = vpop.f32.mrb[2].mxu1 }
 0x289   : > { %v1225_v34 = vadd.f32 %v1224_v33, %v1086_v37  ;;  %v1226_v24 = vpop.f32.mrb[3].mxu1 }
 0x28a   : > { %v1227_v36 = vadd.f32 %v1226_v24, %v1086_v37 }
 0x28c   : > { %v1234_v60 = vcombine.low %v1225_v34, %v1227_v36 }
 0x28e   : > { %v1248_v47 = vrot.slane %v1234_v60, %v1240_v58 }
 0x290   : > { %v1249_v48 = vcombine.low %v1241_v61, %v1248_v47 }
 0x292   : > { %v1256_v62 = vrot.slane %v1249_v48, %v1240_v58 }
 0x294   : > { %1262 = vst.msk [vmem:[%s232_s17] sm:$0xf] %vm1260_vm1, %v1256_v62 }
 0x295   : > { %1789 = shalt.err (!%p1786_p2)
}
 0x296   : > { %s1790_s13 = scalar_lea.hbm %s2346_s30, 64  ;;  %s1794_s12 = scalar_lea.hbm %s2393_s5, 128 }
 0x297   : > { %p1791_p3 = scmp.ne.s32.totalorder %s2346_s30, %s1790_s13  ;;  %p1795_p8 = scmp.lt.u32.totalorder %s2346_s30, %s2393_s5 }
 0x298   : > { %p1796_p10 = scmp.lt.u32.totalorder %s1794_s12, %s1790_s13  ;;  %p1798_p11 = scmp.lt.u32.totalorder %s1790_s13, %s2346_s30 }
 0x299   : > { %p1792_p4 = pnand %p1791_p3, %p1915_p5 }
 0x29a   : > { %p1797_p9 = por %p1796_p10, %p1795_p8 }
 0x29b   : > { %p1793_p7 = pneg %p1792_p4 }
 0x29c   : > { %p1799_p12 = por %p1798_p11, %p1797_p9 }
 0x29e   : > { %p1800_p13 = pnand %p1799_p12, %p1793_p7 }
 0x2a0   : > { %1803 = shalt.err (!%p1800_p13)
}
 0x2a1   : > { %1678 = dma.vmem_to_hbm [thread:$0]  (%p1915_p5), %s2348_s23, 64, %s2346_s30, %s1264_s22  }
 0x2a2 PF: > { %p1690_p0 = scmp.ge.s32.totalorder %s1842_s21, 2  ;;  %s1290_s16 = sand.u32 1, %s1830_s18  }
 0x2a3   : > { %s1291_s17 = scalar_lea.sflag [#allocation3], %s1290_s16 }
 0x2a4   : > { %p1685_p1 = pnand %p1690_p0, %p1919_p6 }
 0x2a6   : > { %1825 = dma.done.wait (!%p1685_p1), %s1291_s17, 64  }
 0x2a7   : > { %1827 = vsyncadd (!%p1685_p1), %s1291_s17, 4294967232  ;;  %p16_p2 = scmp.ge.s32.totalorder %s1902_s24, 4   ;;  %s2397_s18 = smov %s1834_s19 }
 0x2a8   : > { %s2398_s19 = smov %s1838_s20  ;;  %s2399_s20 = smov %s1913_s27 }
 0x2a9   : > { %s2400_s21 = smov %s1902_s24  ;;  %18 = sbr.rel (!%p16_p2) target bundleno = 4 (0x4), region = 80 }
 0x2b0   :  { %1296 = vsyncpa [#allocation3], 1 }
 0x2b1   :  { %1298 = vsyncpa [#allocation3 + $0x1], 1 }
 0x2b2   :  { %1299 = vsyncpa [#allocation4], 1 }
 0x2b3   :  { %1301 = vsyncpa [#allocation4 + $0x1], 1 }

</bundles_post_ra>
